<compile_context>
chip_gen: v7x
topology: tpu7x:2x2x1
jax: 0.10.0
libtpu: 0.0.40
codegen_flags: <defaults>
</compile_context>

<pallas_src>
import functools

import jax
import jax.numpy as jnp
from jax import lax
from jax.experimental import pallas as pl
from jax.experimental.pallas import tpu as pltpu


def _pick_tile(n, target):
    """Largest divisor of n that is <= target and a multiple of 8; else n."""
    if n <= target:
        return n
    for t in range(min(target, n - 1), 7, -1):
        if n % t == 0 and t % 8 == 0:
            return t
    return n


# ----------------------------------------------------------------------------
# Kernel 1: 1x1 conv == matmul over flattened pixels (used for qkv and proj)
# ----------------------------------------------------------------------------
def _pw_kernel(x_ref, w_ref, b_ref, o_ref, *, mxu_dtype):
    acc = jnp.dot(x_ref[...].astype(mxu_dtype), w_ref[...].astype(mxu_dtype),
                  preferred_element_type=jnp.float32)
    o_ref[...] = (acc + b_ref[...].astype(jnp.float32)).astype(o_ref.dtype)


def pointwise_conv(x2d, w, b, *, mxu_dtype=jnp.bfloat16, tile_rows=1024):
    R, Cin = x2d.shape
    Cout = w.shape[1]
    # Big row tiles (mem-bound), but keep >=2 grid steps so megacore can split.
    target = min(tile_rows, max(8, R // 2))
    tr = _pick_tile(R, target)
    return pl.pallas_call(
        functools.partial(_pw_kernel, mxu_dtype=mxu_dtype),
        out_shape=jax.ShapeDtypeStruct((R, Cout), x2d.dtype),
        grid=(R // tr,),
        in_specs=[
            pl.BlockSpec((tr, Cin), lambda i: (i, 0)),
            pl.BlockSpec((Cin, Cout), lambda i: (0, 0)),
            pl.BlockSpec((1, Cout), lambda i: (0, 0)),
        ],
        out_specs=pl.BlockSpec((tr, Cout), lambda i: (i, 0)),
        compiler_params=pltpu.CompilerParams(dimension_semantics=("parallel",)),
    )(x2d, w, b.reshape(1, Cout))


# ----------------------------------------------------------------------------
# Kernel 2: 3x3 depthwise conv (groups == channels), padding=1.
#   Zero border handled via a padded VMEM scratch: one aligned interior store,
#   nine shifted (possibly sublane-unaligned) loads, one full output store.
# ----------------------------------------------------------------------------
def _dw_kernel(x_ref, w_ref, b_ref, o_ref, pad_ref):
    _, H, W, Ct = x_ref.shape
    w = w_ref[...].astype(jnp.float32)                     # (3, 3, Ct)
    x = x_ref[0].astype(jnp.float32)                       # (H, W, Ct)

    # Padded scratch: 1 zero row top/bottom, 8 zero cols left/right (aligned).
    pad_ref[...] = jnp.zeros(pad_ref.shape, jnp.float32)
    pad_ref[1:1 + H, 8:8 + W, :] = x

    acc = x * w[1, 1]                                      # center tap
    for dy in range(3):
        for dx in range(3):
            if dy == 1 and dx == 1:
                continue
            acc = acc + pad_ref[dy:dy + H, 7 + dx:7 + dx + W, :] * w[dy, dx]
    o_ref[0] = (acc + b_ref[0].astype(jnp.float32)).astype(o_ref.dtype)


def depthwise_conv3x3(x_nhwc, w_dw, b_dw):
    B, H, W, C3 = x_nhwc.shape
    # Lane-dense channel tile when the channel count allows it.
    c_tile = 128 if C3 % 128 == 0 else C3
    # TODO(synk): add row tiling with a 1-row halo (manual DMA) for very large
    # H*W so a single (H, W, c_tile) block never has to fit VMEM (v7x 64 MiB).
    return pl.pallas_call(
        _dw_kernel,
        out_shape=jax.ShapeDtypeStruct((B, H, W, C3), x_nhwc.dtype),
        grid=(B, C3 // c_tile),
        in_specs=[
            pl.BlockSpec((1, H, W, c_tile), lambda b, c: (b, 0, 0, c)),
            pl.BlockSpec((3, 3, c_tile), lambda b, c: (0, 0, c)),
            pl.BlockSpec((1, c_tile), lambda b, c: (0, c)),
        ],
        out_specs=pl.BlockSpec((1, H, W, c_tile), lambda b, c: (b, 0, 0, c)),
        scratch_shapes=[pltpu.VMEM((H + 2, W + 16, c_tile), jnp.float32)],
        compiler_params=pltpu.CompilerParams(
            dimension_semantics=("parallel", "parallel"),
            vmem_limit_bytes=48 * 1024 * 1024),
    )(x_nhwc, w_dw, b_dw.reshape(1, C3))


# ----------------------------------------------------------------------------
# Kernel 3: flash-style spatial attention over the fused qkv tensor.
#   q, k L2-normalized over channel dim, attn = softmax(q @ k^T * temperature),
#   out = attn @ v.  All heads of one (batch, q-tile) are processed per call;
#   head / q / k / v selection is done with static channel slices.
# ----------------------------------------------------------------------------
def _attn_kernel(temp_ref, q_rows_ref, kv_rows_ref, o_ref, m_sc, l_sc, acc_sc,
                 *, num_heads, head_dim, mxu_dtype):
    C = num_heads * head_dim
    ki = pl.program_id(2)

    @pl.when(ki == 0)
    def _init():
        m_sc[...] = jnp.full(m_sc.shape, -1e30, m_sc.dtype)
        l_sc[...] = jnp.zeros(l_sc.shape, l_sc.dtype)
        acc_sc[...] = jnp.zeros(acc_sc.shape, acc_sc.dtype)

    q_rows = q_rows_ref[0]     # (TQ, 3C)  -- only channels [0, C) used
    kv_rows = kv_rows_ref[0]   # (TKV, 3C) -- channels [C, 3C) used

    for h in range(num_heads):
        lo = h * head_dim
        q = q_rows[:, lo:lo + head_dim].astype(jnp.float32)             # (TQ, d)
        k = kv_rows[:, C + lo:C + lo + head_dim].astype(jnp.float32)    # (TKV, d)
        v = kv_rows[:, 2 * C + lo:2 * C + lo + head_dim]                # (TKV, d)

        # F.normalize(x, dim=-1): x / max(||x||, 1e-12)  (via rsqrt -> EUP)
        q_inv = lax.rsqrt(jnp.maximum(jnp.sum(q * q, axis=-1, keepdims=True), 1e-24))
        k_inv = lax.rsqrt(jnp.maximum(jnp.sum(k * k, axis=-1, keepdims=True), 1e-24))
        # Fold per-head temperature into q: scales (TQ, d) instead of (TQ, TKV).
        qn = q * (q_inv * temp_ref[h])
        kn = k * k_inv

        s = lax.dot_general(qn.astype(mxu_dtype), kn.astype(mxu_dtype),
                            (((1,), (1,)), ((), ())),
                            preferred_element_type=jnp.float32)         # (TQ, TKV)

        m_prev = m_sc[h]                                                # (TQ, 1)
        m_new = jnp.maximum(m_prev, jnp.max(s, axis=-1, keepdims=True))
        alpha = jnp.exp(m_prev - m_new)
        p = jnp.exp(s - m_new)
        l_sc[h] = alpha * l_sc[h] + jnp.sum(p, axis=-1, keepdims=True)
        acc_sc[h] = alpha * acc_sc[h] + jnp.dot(
            p.astype(mxu_dtype), v.astype(mxu_dtype),
            preferred_element_type=jnp.float32)
        m_sc[h] = m_new

    @pl.when(ki == pl.num_programs(2) - 1)
    def _finalize():
        cols = [acc_sc[h] / l_sc[h] for h in range(num_heads)]
        o_ref[0] = jnp.concatenate(cols, axis=-1).astype(o_ref.dtype)


def attention_core(qkv, temperature, num_heads, *, tile_q=256, tile_kv=512,
                   mxu_dtype=jnp.bfloat16):
    B, HW, C3 = qkv.shape
    C = C3 // 3
    assert C % num_heads == 0
    head_dim = C // num_heads
    tq = _pick_tile(HW, tile_q)
    tkv = _pick_tile(HW, tile_kv)

    kernel = functools.partial(
        _attn_kernel, num_heads=num_heads, head_dim=head_dim, mxu_dtype=mxu_dtype)

    return pl.pallas_call(
        kernel,
        out_shape=jax.ShapeDtypeStruct((B, HW, C), qkv.dtype),
        grid_spec=pltpu.PrefetchScalarGridSpec(
            num_scalar_prefetch=1,
            grid=(B, HW // tq, HW // tkv),
            in_specs=[
                # q-rows view of the fused qkv tensor (constant across ki).
                pl.BlockSpec((1, tq, C3), lambda b, qi, ki, temp: (b, qi, 0)),
                # kv-rows view of the same tensor.
                pl.BlockSpec((1, tkv, C3), lambda b, qi, ki, temp: (b, ki, 0)),
            ],
            out_specs=pl.BlockSpec((1, tq, C), lambda b, qi, ki, temp: (b, qi, 0)),
            scratch_shapes=[
                pltpu.VMEM((num_heads, tq, 1), jnp.float32),         # running max
                pltpu.VMEM((num_heads, tq, 1), jnp.float32),         # running sum
                pltpu.VMEM((num_heads, tq, head_dim), jnp.float32),  # accumulator
            ],
        ),
        compiler_params=pltpu.CompilerParams(
            dimension_semantics=("parallel", "parallel", "arbitrary"),
            vmem_limit_bytes=48 * 1024 * 1024),
    )(temperature, qkv, qkv)   # same fused tensor feeds both q and kv views


# ----------------------------------------------------------------------------
# Full forward (glue in plain JAX; only the NCHW<->NHWC boundary transposes
# remain — no head-split / output transposes, no HBM padding pass).
# ----------------------------------------------------------------------------
def restormer_attention(x, params, *, mxu_dtype=jnp.bfloat16,
                        attn_tile_q=256, attn_tile_kv=512):
    B, C, H, W = x.shape
    heads = params["num_heads"]
    HW = H * W

    xh = jnp.transpose(x, (0, 2, 3, 1)).reshape(B * HW, C)          # NCHW -> rows
    qkv = pointwise_conv(xh, params["w_qkv"], params["b_qkv"], mxu_dtype=mxu_dtype)
    qkv = depthwise_conv3x3(qkv.reshape(B, H, W, 3 * C),
                            params["w_dw"], params["b_dw"])
    out = attention_core(qkv.reshape(B, HW, 3 * C), params["temperature"], heads,
                         tile_q=attn_tile_q, tile_kv=attn_tile_kv,
                         mxu_dtype=mxu_dtype)                        # (B, HW, C)
    out = pointwise_conv(out.reshape(B * HW, C),
                         params["w_proj"], params["b_proj"], mxu_dtype=mxu_dtype)
    return out.reshape(B, H, W, C).transpose(0, 3, 1, 2)             # -> NCHW


# ----------------------------------------------------------------------------
# Pure-JAX f32 reference for verification
# ----------------------------------------------------------------------------
def reference(x, params):
    B, C, H, W = x.shape
    heads = params["num_heads"]
    Ch = C // heads
    HW = H * W
    xh = jnp.transpose(x, (0, 2, 3, 1))
    qkv = jnp.einsum("bhwc,cd->bhwd", xh, params["w_qkv"]) + params["b_qkv"]
    xp = jnp.pad(qkv, ((0, 0), (1, 1), (1, 1), (0, 0)))
    dw = jnp.zeros_like(qkv)
    for dy in range(3):
        for dx in range(3):
            dw = dw + xp[:, dy:dy + H, dx:dx + W, :] * params["w_dw"][dy, dx]
    dw = dw + params["b_dw"]
    dw = dw.reshape(B, HW, 3 * C)
    q, k, v = dw[..., :C], dw[..., C:2 * C], dw[..., 2 * C:]

    def to_heads(t):
        return t.reshape(B, HW, heads, Ch).transpose(0, 2, 1, 3)

    q, k, v = to_heads(q), to_heads(k), to_heads(v)
    qn = q / jnp.maximum(jnp.linalg.norm(q, axis=-1, keepdims=True), 1e-12)
    kn = k / jnp.maximum(jnp.linalg.norm(k, axis=-1, keepdims=True), 1e-12)
    s = jnp.einsum("bnqc,bnkc->bnqk", qn, kn) * params["temperature"][None, :, None, None]
    p = jax.nn.softmax(s, axis=-1)
    out = jnp.einsum("bnqk,bnkc->bnqc", p, v)
    out = out.transpose(0, 2, 1, 3).reshape(B, HW, C)
    out = out @ params["w_proj"] + params["b_proj"]
    return out.reshape(B, H, W, C).transpose(0, 3, 1, 2)


if __name__ == "__main__":
    B, C, H, W = 2, 8, 16, 16
    num_heads = 2

    key = jax.random.PRNGKey(0)
    ks = jax.random.split(key, 8)

    params = {
        "num_heads": num_heads,
        # qkv 1x1 conv: PyTorch weight (3C, C, 1, 1) -> matmul weight (C, 3C)
        "w_qkv": 0.1 * jax.random.normal(ks[0], (C, 3 * C), jnp.float32),
        "b_qkv": 0.1 * jax.random.normal(ks[1], (3 * C,), jnp.float32),
        # depthwise 3x3 conv: PyTorch weight (3C, 1, 3, 3) -> (3, 3, 3C)
        "w_dw": 0.1 * jax.random.normal(ks[2], (3, 3, 3 * C), jnp.float32),
        "b_dw": 0.1 * jax.random.normal(ks[3], (3 * C,), jnp.float32),
        # project_out 1x1 conv: (C, C, 1, 1) -> (C, C)
        "w_proj": 0.1 * jax.random.normal(ks[4], (C, C), jnp.float32),
        "b_proj": 0.1 * jax.random.normal(ks[5], (C,), jnp.float32),
        # temperature initialized to ones, as in the module
        "temperature": jnp.ones((num_heads,), jnp.float32),
    }

    x = jax.random.normal(ks[6], (B, C, H, W), jnp.float32)
    ref = reference(x, params)

    # 1) Exact path: f32 MXU operands + small attention tiles so the
    #    multi-step online-softmax accumulation is actually exercised.
    out_f32 = jax.block_until_ready(
        restormer_attention(x, params, mxu_dtype=jnp.float32,
                            attn_tile_q=128, attn_tile_kv=128))
    assert out_f32.shape == (B, C, H, W)
    err_f32 = float(jnp.max(jnp.abs(out_f32 - ref)))
    assert bool(jnp.allclose(out_f32, ref, atol=2e-4, rtol=2e-4)), \
        f"f32 path mismatch vs reference: max abs err {err_f32}"

    # 2) Optimized path: bf16 MXU operands, f32 accumulation / softmax / norms.
    #    Loose sanity threshold (bf16 rounding of the full conv->attn->conv chain).
    out_bf16 = jax.block_until_ready(restormer_attention(x, params))
    assert out_bf16.shape == (B, C, H, W)
    err_bf16 = float(jnp.max(jnp.abs(out_bf16 - ref)))
    assert err_bf16 < 1e-1, f"bf16 path mismatch vs reference: max abs err {err_bf16}"

    print("KERNEL_OK")
</pallas_src>

<mosaic_0001>
module attributes {stable_mosaic.version = 11 : i64} {
  func.func @_pw_kernel(%arg0: i32, %arg1: memref<256x8xf32, #tpu.memory_space<vmem>>, %arg2: memref<8x24xf32, #tpu.memory_space<vmem>>, %arg3: memref<1x24xf32, #tpu.memory_space<vmem>>, %arg4: memref<256x24xf32, #tpu.memory_space<vmem>>) attributes {dimension_semantics = [#tpu.dimension_semantics<parallel>], iteration_bounds = array<i64: 2>, scalar_prefetch = 0 : i64, scratch_operands = 0 : i64, tpu.core_type = #tpu.core_type<tc>, window_params = [{transform_indices = @transform_0, window_bounds = array<i64: 256, 8>}, {pipeline_mode = #tpu.pipeline_mode<synchronous>, transform_indices = @transform_1, window_bounds = array<i64: 8, 24>}, {pipeline_mode = #tpu.pipeline_mode<synchronous>, transform_indices = @transform_2, window_bounds = array<i64: 1, 24>}, {transform_indices = @transform_3, window_bounds = array<i64: 256, 24>}]} {
    %c0 = arith.constant 0 : index
    %c0_0 = arith.constant 0 : index
    %0 = vector.load %arg1[%c0, %c0_0] : memref<256x8xf32, #tpu.memory_space<vmem>>, vector<256x8xf32>
    %c0_1 = arith.constant 0 : index
    %c0_2 = arith.constant 0 : index
    %1 = vector.load %arg2[%c0_1, %c0_2] : memref<8x24xf32, #tpu.memory_space<vmem>>, vector<8x24xf32>
    %cst = arith.constant dense<0.000000e+00> : vector<256x24xf32>
    %2 = tpu.matmul %0, %1, %cst {dimension_numbers = #tpu.dot_dimension_numbers<[1], [0], [0], [1], [0, 0, 1, 1], [], []>} : vector<256x8xf32>, vector<8x24xf32>, vector<256x24xf32> -> vector<256x24xf32>
    %c0_3 = arith.constant 0 : index
    %c0_4 = arith.constant 0 : index
    %3 = vector.load %arg3[%c0_3, %c0_4] : memref<1x24xf32, #tpu.memory_space<vmem>>, vector<1x24xf32>
    %4 = vector.broadcast %3 : vector<1x24xf32> to vector<256x24xf32>
    %5 = arith.addf %2, %4 : vector<256x24xf32>
    %c0_5 = arith.constant 0 : index
    %c0_6 = arith.constant 0 : index
    %6 = vector.load %arg4[%c0_5, %c0_6] : memref<256x24xf32, #tpu.memory_space<vmem>>, vector<256x24xf32>
    tpu.vector_store %arg4[%c0_5, %c0_6], %5 {strides = array<i32>} : memref<256x24xf32, #tpu.memory_space<vmem>>, vector<256x24xf32>,
    return
  }
  func.func @transform_0(%arg0: i32) -> (i32, i32) {
    %c0_i32 = arith.constant 0 : i32
    %c0_i32_0 = arith.constant 0 : i32
    return %arg0, %c0_i32 : i32, i32
  }
  func.func @transform_1(%arg0: i32) -> (i32, i32) {
    %c0_i32 = arith.constant 0 : i32
    %c0_i32_0 = arith.constant 0 : i32
    %c0_i32_1 = arith.constant 0 : i32
    return %c0_i32, %c0_i32_0 : i32, i32
  }
  func.func @transform_2(%arg0: i32) -> (i32, i32) {
    %c0_i32 = arith.constant 0 : i32
    %c0_i32_0 = arith.constant 0 : i32
    %c0_i32_1 = arith.constant 0 : i32
    return %c0_i32, %c0_i32_0 : i32, i32
  }
  func.func @transform_3(%arg0: i32) -> (i32, i32) {
    %c0_i32 = arith.constant 0 : i32
    %c0_i32_0 = arith.constant 0 : i32
    return %arg0, %c0_i32 : i32, i32
  }
}

</mosaic_0001>

<bundles_post_ra>
// kernel: tpu_custom_call.1
= control target key start
LH: loop header
LB: loop body
LE: loop exit
PB: predicated region body
PF: predicated region fallthrough
CT: control target
= control target key end

     0   :  { %s790_s12 = smov 0   ;;  %s986_s0 = inlined_call_operand.vmem [shape: f32[512,8], index: 0, kind: input, shape index: {}]   ;;  %s987_s1 = inlined_call_operand.vmem [shape: f32[8,24], index: 1, kind: input, shape index: {}]   ;;  %s988_s2 = inlined_call_operand.vmem [shape: f32[1,24], index: 2, kind: input, shape index: {}]   ;;  %s989_s3 = inlined_call_operand.vmem [shape: f32[512,24], index: 3, kind: output, shape index: {}]  }
   0x1 LB: > { %s625_s13 = sadd.s32 4294967295, %s768_s12   ;;  %p629_p0 = scmp.ge.s32.totalorder %s768_s12, 1  ;;  %s768_s12 = sphi %s790_s12, %s13_s12  }
   0x2   : > { %p138_p1 = scmp.lt.s32.totalorder %s768_s12, 3 }
   0x4   : > { %p139_p2 = pnand %p629_p0, %p138_p1 }
   0x5   : > { %v206_v0 = vld [vmem:[%s987_s1] sm:$0xff] (!%p139_p2)  ;;  %s630_s16 = sshll.u32 (!%p139_p2), %s625_s13, 5  ;;  %vm214_vm0 = vcmask (!%p139_p2), 64512   ;;  %vm536_vm1 = vcmask (!%p139_p2), 195584  }
   0x6   : > { %142 = sbr.rel (%p139_p2) target bundleno = 263 (0x107), region = 32  ;;  %702 = vmatprep.subr.mxu0 (!%p139_p2), %v206_v0  ;;  %752 = vmatprep.subr.mxu1 (!%p139_p2), %v206_v0  ;;  %p163_p3 = scmp.lt.s32.totalorder (!%p139_p2), %s630_s16, 63  ;;  %v878_v33 = vld [vmem:[%s988_s2] ss:$0 sm:$0xff] (!%p139_p2) }
   0x7   : > { %703 = vmatpush3.msra.mxu0 (!%p139_p2), %v206_v0  ;;  %753 = vmatpush3.msra.mxu1 (!%p139_p2), %v206_v0 }
   0xd   : > { %s991_s16 = smov (!%p163_p3, %s630_s16), 63 }
   0xe   : > { %s631_s17 = sshll.u32 %s991_s16, 3 }
   0xf   : > { %s809_s20 = scalar_lea.vmem %s986_s0, %s631_s17  ;;  %s885_s25 = scalar_lea.vmem %s989_s3, %s631_s17 }
  0x10   : > { %v174_v1 = vld [vmem:[%s809_s20] sm:$0xff]  ;;  %v175_v3 = vld [vmem:[%s809_s20 + $0x8] sm:$0xff]  ;;  %v176_v5 = vld [vmem:[%s809_s20 + $0x10] sm:$0xff] }
  0x11   : > { %v190_v2 = vld [vmem:[%s809_s20 + $0x80] sm:$0xff]  ;;  %704 = vmatprep.mubr.msk.f32.mxu0 %vm214_vm0, %v174_v1  ;;  %v191_v4 = vld [vmem:[%s809_s20 + $0x88] sm:$0xff]  ;;  %v192_v6 = vld [vmem:[%s809_s20 + $0x90] sm:$0xff] }
  0x12   : > { %728 = vmatprep.mubr.msk.f32.mxu1 %vm214_vm0, %v190_v2  ;;  %705 = vmatmul.mubr.msk.f32.vlgmr.msra.gmra.mrb[0].mxu0 %vm214_vm0, %v175_v3  ;;  %v177_v7 = vld [vmem:[%s809_s20 + $0x18] sm:$0xff]  ;;  %v178_v9 = vld [vmem:[%s809_s20 + $0x20] sm:$0xff]  ;;  %v179_v11 = vld [vmem:[%s809_s20 + $0x28] sm:$0xff] }
  0x13   : > { %729 = vmatmul.mubr.msk.f32.vlgmr.msra.gmra.mrb[0].mxu1 %vm214_vm0, %v191_v4  ;;  %707 = vmatprep.mubr.msk.f32.mxu0 %vm214_vm0, %v176_v5  ;;  %v193_v8 = vld [vmem:[%s809_s20 + $0x98] sm:$0xff]  ;;  %v194_v10 = vld [vmem:[%s809_s20 + $0xa0] sm:$0xff]  ;;  %v195_v12 = vld [vmem:[%s809_s20 + $0xa8] sm:$0xff] }
  0x14   : > { %731 = vmatprep.mubr.msk.f32.mxu1 %vm214_vm0, %v192_v6  ;;  %v180_v13 = vld [vmem:[%s809_s20 + $0x30] sm:$0xff]  ;;  %v181_v15 = vld [vmem:[%s809_s20 + $0x38] sm:$0xff]  ;;  %v182_v17 = vld [vmem:[%s809_s20 + $0x40] sm:$0xff] }
  0x15   : > { %v196_v14 = vld [vmem:[%s809_s20 + $0xb0] sm:$0xff]  ;;  %v197_v16 = vld [vmem:[%s809_s20 + $0xb8] sm:$0xff]  ;;  %v198_v18 = vld [vmem:[%s809_s20 + $0xc0] sm:$0xff] }
  0x16   : > { %708 = vmatmul.mubr.msk.f32.gmra.mrb[2].mxu0 %vm214_vm0, %v177_v7  ;;  %v183_v19 = vld [vmem:[%s809_s20 + $0x48] sm:$0xff]  ;;  %v184_v21 = vld [vmem:[%s809_s20 + $0x50] sm:$0xff]  ;;  %v185_v23 = vld [vmem:[%s809_s20 + $0x58] sm:$0xff] }
  0x17   : > { %732 = vmatmul.mubr.msk.f32.gmra.mrb[2].mxu1 %vm214_vm0, %v193_v8  ;;  %710 = vmatprep.mubr.msk.f32.mxu0 %vm214_vm0, %v178_v9  ;;  %v199_v20 = vld [vmem:[%s809_s20 + $0xc8] sm:$0xff]  ;;  %v200_v22 = vld [vmem:[%s809_s20 + $0xd0] sm:$0xff]  ;;  %v201_v24 = vld [vmem:[%s809_s20 + $0xd8] sm:$0xff] }
  0x18   : > { %734 = vmatprep.mubr.msk.f32.mxu1 %vm214_vm0, %v194_v10  ;;  %v186_v25 = vld [vmem:[%s809_s20 + $0x60] sm:$0xff]  ;;  %v187_v27 = vld [vmem:[%s809_s20 + $0x68] sm:$0xff]  ;;  %v188_v29 = vld [vmem:[%s809_s20 + $0x70] sm:$0xff] }
  0x19   : > { %v202_v26 = vld [vmem:[%s809_s20 + $0xe0] sm:$0xff]  ;;  %v203_v28 = vld [vmem:[%s809_s20 + $0xe8] sm:$0xff]  ;;  %v204_v30 = vld [vmem:[%s809_s20 + $0xf0] sm:$0xff] }
  0x1a   : > { %711 = vmatmul.mubr.msk.f32.gmra.mrb[4].mxu0 %vm214_vm0, %v179_v11  ;;  %v189_v31 = vld [vmem:[%s809_s20 + $0x78] sm:$0xff] }
  0x1b   : > { %735 = vmatmul.mubr.msk.f32.gmra.mrb[4].mxu1 %vm214_vm0, %v195_v12  ;;  %713 = vmatprep.mubr.msk.f32.mxu0 %vm214_vm0, %v180_v13  ;;  %v205_v32 = vld [vmem:[%s809_s20 + $0xf8] sm:$0xff] }
  0x1c   : > { %737 = vmatprep.mubr.msk.f32.mxu1 %vm214_vm0, %v196_v14 }
  0x1e   : > { %714 = vmatmul.mubr.msk.f32.gmra.mrb[6].mxu0 %vm214_vm0, %v181_v15 }
  0x1f   : > { %738 = vmatmul.mubr.msk.f32.gmra.mrb[6].mxu1 %vm214_vm0, %v197_v16  ;;  %716 = vmatprep.mubr.msk.f32.mxu0 %vm214_vm0, %v182_v17 }
  0x20   : > { %740 = vmatprep.mubr.msk.f32.mxu1 %vm214_vm0, %v198_v18 }
  0x22   : > { %717 = vmatmul.mubr.msk.f32.gmra.mrb[8].mxu0 %vm214_vm0, %v183_v19 }
  0x23   : > { %741 = vmatmul.mubr.msk.f32.gmra.mrb[8].mxu1 %vm214_vm0, %v199_v20  ;;  %719 = vmatprep.mubr.msk.f32.mxu0 %vm214_vm0, %v184_v21 }
  0x24   : > { %743 = vmatprep.mubr.msk.f32.mxu1 %vm214_vm0, %v200_v22 }
  0x26   : > { %720 = vmatmul.mubr.msk.f32.gmra.mrb[10].mxu0 %vm214_vm0, %v185_v23 }
  0x27   : > { %744 = vmatmul.mubr.msk.f32.gmra.mrb[10].mxu1 %vm214_vm0, %v201_v24  ;;  %722 = vmatprep.mubr.msk.f32.mxu0 %vm214_vm0, %v186_v25 }
  0x28   : > { %746 = vmatprep.mubr.msk.f32.mxu1 %vm214_vm0, %v202_v26 }
  0x2a   : > { %723 = vmatmul.mubr.msk.f32.gmra.mrb[12].mxu0 %vm214_vm0, %v187_v27 }
  0x2b   : > { %747 = vmatmul.mubr.msk.f32.gmra.mrb[12].mxu1 %vm214_vm0, %v203_v28  ;;  %725 = vmatprep.mubr.msk.f32.mxu0 %vm214_vm0, %v188_v29 }
  0x2c   : > { %749 = vmatprep.mubr.msk.f32.mxu1 %vm214_vm0, %v204_v30 }
  0x2e   : > { %726 = vmatmul.mubr.msk.f32.gmra.mrb[14].mxu0 %vm214_vm0, %v189_v31 }
  0x2f   : > { %750 = vmatmul.mubr.msk.f32.gmra.mrb[14].mxu1 %vm214_vm0, %v205_v32 }
  0xe5   : > { %v706_v34 = vpop.f32.mrb[0].mxu0 }
  0xe6   : > { %v730_v35 = vpop.f32.mrb[0].mxu1  ;;  %v383_v36 = vadd.f32 %v706_v34, %v878_v33  ;;  %v377_v38 = vpop.f32.mrb[1].mxu0 }
  0xe7   : > { %v463_v37 = vadd.f32 %v730_v35, %v878_v33  ;;  %v457_v39 = vpop.f32.mrb[1].mxu1  ;;  %v378_v40 = vadd.f32 %v878_v33, %v377_v38 }
  0xe8   : > { %v458_v41 = vadd.f32 %v878_v33, %v457_v39  ;;  %538 = vst.msk [vmem:[%s885_s25 + $0x8] sm:$0xff] %vm536_vm1, %v383_v36 }
  0xe9   : > { %554 = vst.msk [vmem:[%s885_s25 + $0x88] sm:$0xff] %vm536_vm1, %v463_v37  ;;  %537 = vst.msk [vmem:[%s885_s25] sm:$0xff] %vm536_vm1, %v378_v40  ;;  %v709_v42 = vpop.f32.mrb[2].mxu0 }
  0xea   : > { %553 = vst.msk [vmem:[%s885_s25 + $0x80] sm:$0xff] %vm536_vm1, %v458_v41  ;;  %v733_v43 = vpop.f32.mrb[2].mxu1  ;;  %v393_v44 = vadd.f32 %v709_v42, %v878_v33  ;;  %v387_v46 = vpop.f32.mrb[3].mxu0 }
  0xeb   : > { %v473_v45 = vadd.f32 %v733_v43, %v878_v33  ;;  %v467_v47 = vpop.f32.mrb[3].mxu1  ;;  %v388_v48 = vadd.f32 %v878_v33, %v387_v46 }
  0xec   : > { %v468_v49 = vadd.f32 %v878_v33, %v467_v47  ;;  %540 = vst.msk [vmem:[%s885_s25 + $0x18] sm:$0xff] %vm536_vm1, %v393_v44 }
  0xed   : > { %556 = vst.msk [vmem:[%s885_s25 + $0x98] sm:$0xff] %vm536_vm1, %v473_v45  ;;  %539 = vst.msk [vmem:[%s885_s25 + $0x10] sm:$0xff] %vm536_vm1, %v388_v48  ;;  %v712_v50 = vpop.f32.mrb[4].mxu0 }
  0xee   : > { %555 = vst.msk [vmem:[%s885_s25 + $0x90] sm:$0xff] %vm536_vm1, %v468_v49  ;;  %v736_v51 = vpop.f32.mrb[4].mxu1  ;;  %v403_v52 = vadd.f32 %v712_v50, %v878_v33  ;;  %v397_v54 = vpop.f32.mrb[5].mxu0 }
  0xef   : > { %v483_v53 = vadd.f32 %v736_v51, %v878_v33  ;;  %v477_v55 = vpop.f32.mrb[5].mxu1  ;;  %v398_v56 = vadd.f32 %v878_v33, %v397_v54 }
  0xf0   : > { %v478_v57 = vadd.f32 %v878_v33, %v477_v55  ;;  %542 = vst.msk [vmem:[%s885_s25 + $0x28] sm:$0xff] %vm536_vm1, %v403_v52 }
  0xf1   : > { %558 = vst.msk [vmem:[%s885_s25 + $0xa8] sm:$0xff] %vm536_vm1, %v483_v53  ;;  %541 = vst.msk [vmem:[%s885_s25 + $0x20] sm:$0xff] %vm536_vm1, %v398_v56  ;;  %v715_v58 = vpop.f32.mrb[6].mxu0 }
  0xf2   : > { %557 = vst.msk [vmem:[%s885_s25 + $0xa0] sm:$0xff] %vm536_vm1, %v478_v57  ;;  %v739_v59 = vpop.f32.mrb[6].mxu1  ;;  %v413_v60 = vadd.f32 %v715_v58, %v878_v33  ;;  %v407_v62 = vpop.f32.mrb[7].mxu0 }
  0xf3   : > { %v493_v61 = vadd.f32 %v739_v59, %v878_v33  ;;  %v487_v63 = vpop.f32.mrb[7].mxu1  ;;  %v408_v0 = vadd.f32 %v878_v33, %v407_v62 }
  0xf4   : > { %v488_v1 = vadd.f32 %v878_v33, %v487_v63  ;;  %544 = vst.msk [vmem:[%s885_s25 + $0x38] sm:$0xff] %vm536_vm1, %v413_v60 }
  0xf5   : > { %560 = vst.msk [vmem:[%s885_s25 + $0xb8] sm:$0xff] %vm536_vm1, %v493_v61  ;;  %543 = vst.msk [vmem:[%s885_s25 + $0x30] sm:$0xff] %vm536_vm1, %v408_v0  ;;  %v718_v2 = vpop.f32.mrb[8].mxu0 }
  0xf6   : > { %559 = vst.msk [vmem:[%s885_s25 + $0xb0] sm:$0xff] %vm536_vm1, %v488_v1  ;;  %v742_v3 = vpop.f32.mrb[8].mxu1  ;;  %v423_v4 = vadd.f32 %v718_v2, %v878_v33  ;;  %v417_v6 = vpop.f32.mrb[9].mxu0 }
  0xf7   : > { %v503_v5 = vadd.f32 %v742_v3, %v878_v33  ;;  %v497_v7 = vpop.f32.mrb[9].mxu1  ;;  %v418_v8 = vadd.f32 %v878_v33, %v417_v6 }
  0xf8   : > { %v498_v9 = vadd.f32 %v878_v33, %v497_v7  ;;  %546 = vst.msk [vmem:[%s885_s25 + $0x48] sm:$0xff] %vm536_vm1, %v423_v4 }
  0xf9   : > { %562 = vst.msk [vmem:[%s885_s25 + $0xc8] sm:$0xff] %vm536_vm1, %v503_v5  ;;  %545 = vst.msk [vmem:[%s885_s25 + $0x40] sm:$0xff] %vm536_vm1, %v418_v8  ;;  %v721_v10 = vpop.f32.mrb[10].mxu0 }
  0xfa   : > { %561 = vst.msk [vmem:[%s885_s25 + $0xc0] sm:$0xff] %vm536_vm1, %v498_v9  ;;  %v745_v11 = vpop.f32.mrb[10].mxu1  ;;  %v433_v12 = vadd.f32 %v721_v10, %v878_v33  ;;  %v427_v14 = vpop.f32.mrb[11].mxu0 }
  0xfb   : > { %v513_v13 = vadd.f32 %v745_v11, %v878_v33  ;;  %v507_v15 = vpop.f32.mrb[11].mxu1  ;;  %v428_v16 = vadd.f32 %v878_v33, %v427_v14 }
  0xfc   : > { %v508_v17 = vadd.f32 %v878_v33, %v507_v15  ;;  %548 = vst.msk [vmem:[%s885_s25 + $0x58] sm:$0xff] %vm536_vm1, %v433_v12 }
  0xfd   : > { %564 = vst.msk [vmem:[%s885_s25 + $0xd8] sm:$0xff] %vm536_vm1, %v513_v13  ;;  %547 = vst.msk [vmem:[%s885_s25 + $0x50] sm:$0xff] %vm536_vm1, %v428_v16  ;;  %v724_v18 = vpop.f32.mrb[12].mxu0 }
  0xfe   : > { %563 = vst.msk [vmem:[%s885_s25 + $0xd0] sm:$0xff] %vm536_vm1, %v508_v17  ;;  %v748_v19 = vpop.f32.mrb[12].mxu1  ;;  %v443_v20 = vadd.f32 %v724_v18, %v878_v33  ;;  %v437_v22 = vpop.f32.mrb[13].mxu0 }
  0xff   : > { %v523_v21 = vadd.f32 %v748_v19, %v878_v33  ;;  %v517_v23 = vpop.f32.mrb[13].mxu1  ;;  %v438_v24 = vadd.f32 %v878_v33, %v437_v22 }
 0x100   : > { %v518_v25 = vadd.f32 %v878_v33, %v517_v23  ;;  %550 = vst.msk [vmem:[%s885_s25 + $0x68] sm:$0xff] %vm536_vm1, %v443_v20 }
 0x101   : > { %566 = vst.msk [vmem:[%s885_s25 + $0xe8] sm:$0xff] %vm536_vm1, %v523_v21  ;;  %549 = vst.msk [vmem:[%s885_s25 + $0x60] sm:$0xff] %vm536_vm1, %v438_v24  ;;  %v727_v26 = vpop.f32.mrb[14].mxu0 }
 0x102   : > { %565 = vst.msk [vmem:[%s885_s25 + $0xe0] sm:$0xff] %vm536_vm1, %v518_v25  ;;  %v751_v27 = vpop.f32.mrb[14].mxu1  ;;  %v453_v28 = vadd.f32 %v727_v26, %v878_v33  ;;  %v447_v30 = vpop.f32.mrb[15].mxu0 }
 0x103   : > { %v533_v29 = vadd.f32 %v751_v27, %v878_v33  ;;  %v527_v31 = vpop.f32.mrb[15].mxu1  ;;  %v448_v32 = vadd.f32 %v878_v33, %v447_v30 }
 0x104   : > { %v528_v34 = vadd.f32 %v878_v33, %v527_v31  ;;  %552 = vst.msk [vmem:[%s885_s25 + $0x78] sm:$0xff] %vm536_vm1, %v453_v28 }
 0x105   : > { %568 = vst.msk [vmem:[%s885_s25 + $0xf8] sm:$0xff] %vm536_vm1, %v533_v29  ;;  %551 = vst.msk [vmem:[%s885_s25 + $0x70] sm:$0xff] %vm536_vm1, %v448_v32 }
 0x106   : > { %567 = vst.msk [vmem:[%s885_s25 + $0xf0] sm:$0xff] %vm536_vm1, %v528_v34 }
 0x107 PF: > { %s13_s12 = sadd.s32 1, %s768_s12  }
 0x108   : > { %p10_p4 = scmp.ge.s32.totalorder %s13_s12, 4  }
 0x10a   :  { %12 = sbr.rel (!%p10_p4) target bundleno = 1 (0x1), region = 62 }

</bundles_post_ra>
